<compile_context>
chip_gen: v6e
topology: v6e:2x2x1
jax: 0.10.0
libtpu: 0.0.40
codegen_flags: <defaults>
</compile_context>

<pallas_src>
import functools

import jax
import jax.numpy as jnp
from jax import lax
from jax.experimental import pallas as pl
from jax.experimental.pallas import tpu as pltpu

BN_EPS = 1e-5
LEAKY_SLOPE = 0.2


def _round_up(x, m):
    return ((x + m - 1) // m) * m


def _fused_kernel(x_ref, w1_ref, g1_ref, b1_ref, w2_ref, g2_ref, b2_ref,
                  o_ref,
                  s1_ref, q1_ref, s2_ref, q2_ref, st1_ref, st2_ref,
                  *, m_valid, padded, use_mxu):
    """Fused TransferConv_h forward, 3-phase accumulate-then-apply BN.

    x_ref / o_ref : (C, TILE_M)   lane-dense slab tiles
    w*_ref        : (C, C)        1x1 conv weights (bias cancels against BN mean)
    g*/b*_ref     : (C, 1)        BatchNorm gamma / beta
    s*/q*_ref     : (C, 128)      VPU partial sum / sum-of-squares accumulators
    st*_ref       : (2, C, 1)     finalized [mean, rstd]
    """
    phase = pl.program_id(0)          # 0: BN1 stats, 1: BN2 stats, 2: apply+store
    t = pl.program_id(1)
    C, TM = o_ref.shape
    inv_m = 1.0 / float(m_valid)

    def conv1x1(w_ref, v):
        """(C,C) @ (C,TM).  MXU for wide C, unrolled VPU rank-1 updates for tiny C."""
        if use_mxu:
            return jnp.dot(w_ref[...], v.astype(w_ref.dtype),
                           preferred_element_type=jnp.float32)
        w = w_ref[...].astype(jnp.float32)
        vf = v.astype(jnp.float32)
        acc = w[:, 0:1] * vf[0:1, :]
        for c in range(1, C):
            acc = acc + w[:, c:c + 1] * vf[c:c + 1, :]
        return acc

    def accum_stats(y, s_ref, q_ref):
        """Fold a (C, TM) tile into (C,128) partials — VPU adds only, no XLU."""
        s = s_ref[...]
        q = q_ref[...]
        for j in range(TM // 128):
            blk = y[:, j * 128:(j + 1) * 128]
            s = s + blk
            q = q + blk * blk
        s_ref[...] = s
        q_ref[...] = q

    def finalize_stats(s_ref, q_ref, st_ref):
        """(C,128) partials -> mean / rstd.  One cross-lane reduce, clamped var."""
        s = jnp.sum(s_ref[...], axis=-1, keepdims=True)            # (C, 1)
        q = jnp.sum(q_ref[...], axis=-1, keepdims=True)            # (C, 1)
        mean = s * inv_m
        var = jnp.maximum(q * inv_m - mean * mean, 0.0)             # biased, clamped
        st_ref[0] = mean
        st_ref[1] = lax.rsqrt(var + BN_EPS)

    def bn_lrelu(y, st_ref, g_ref, b_ref):
        y = (y - st_ref[0]) * (st_ref[1] * g_ref[...]) + b_ref[...]
        return jnp.maximum(y, LEAKY_SLOPE * y)                      # LeakyReLU(0.2)

    # Layer-1 conv is cheap: recompute it every phase instead of holding a
    # (C, M) intermediate slab resident in VMEM.
    y1 = conv1x1(w1_ref, x_ref[...])

    # ---------------- phase 0: accumulate BN1 batch statistics ----------------
    @pl.when(jnp.logical_and(phase == 0, t == 0))
    def _():
        s1_ref[...] = jnp.zeros_like(s1_ref)
        q1_ref[...] = jnp.zeros_like(q1_ref)

    @pl.when(phase == 0)
    def _():
        accum_stats(y1, s1_ref, q1_ref)

    # ---------------- phase 1: finalize BN1, accumulate BN2 stats -------------
    @pl.when(jnp.logical_and(phase == 1, t == 0))
    def _():
        finalize_stats(s1_ref, q1_ref, st1_ref)
        s2_ref[...] = jnp.zeros_like(s2_ref)
        q2_ref[...] = jnp.zeros_like(q2_ref)

    @pl.when(phase == 1)
    def _():
        z1 = bn_lrelu(y1, st1_ref, g1_ref, b1_ref)
        y2 = conv1x1(w2_ref, z1)
        if padded:
            # Lane-padded columns of x are zero (so BN1 stats are clean), but
            # after BN1+bias they become nonzero -> mask them out of BN2 stats.
            col = lax.broadcasted_iota(jnp.int32, (C, TM), 1) + t * TM
            y2 = jnp.where(col < m_valid, y2, 0.0)
        accum_stats(y2, s2_ref, q2_ref)

    # ---------------- phase 2: finalize BN2, apply both layers, store ---------
    @pl.when(jnp.logical_and(phase == 2, t == 0))
    def _():
        finalize_stats(s2_ref, q2_ref, st2_ref)

    @pl.when(phase == 2)
    def _():
        z1 = bn_lrelu(y1, st1_ref, g1_ref, b1_ref)
        y2 = conv1x1(w2_ref, z1)
        o_ref[...] = bn_lrelu(y2, st2_ref, g2_ref, b2_ref).astype(o_ref.dtype)


@functools.partial(jax.jit, static_argnames=("tile_m", "io_dtype"))
def transfer_conv_h_forward(x_nchw, params, *, tile_m=512, io_dtype=jnp.float32):
    """TransferConv_h forward.  Input/output NCHW, same channel count.

    io_dtype=jnp.bfloat16 halves HBM traffic on v6e/v7x (BN math stays f32).
    """
    N, C, H, W = x_nchw.shape
    M = N * H * W
    itemsize = jnp.dtype(io_dtype).itemsize

    # Channels-first lane-dense slab (C, M); transpose/reshape are wrapper-side
    # layout plumbing so the kernel sees one well-shaped contraction.
    x2 = jnp.transpose(x_nchw, (1, 0, 2, 3)).reshape(C, M).astype(io_dtype)

    # Lane-pad M to a multiple of 128 (padded columns masked out of BN2 stats).
    M_pad = _round_up(M, 128)
    if M_pad != M:
        x2 = jnp.pad(x2, ((0, 0), (0, M_pad - M)))

    # Tile size: multiple of 128 that divides M_pad (128 always works).
    tm = max(128, (min(tile_m, M_pad) // 128) * 128)
    while M_pad % tm:
        tm -= 128
    n_tiles = M_pad // tm

    p1, p2 = params
    w1 = p1["w"].astype(io_dtype)
    w2 = p2["w"].astype(io_dtype)
    g1 = p1["gamma"].reshape(C, 1).astype(jnp.float32)
    b1 = p1["beta"].reshape(C, 1).astype(jnp.float32)
    g2 = p2["gamma"].reshape(C, 1).astype(jnp.float32)
    b2 = p2["beta"].reshape(C, 1).astype(jnp.float32)

    use_mxu = C >= 64           # tiny C: skip the MXU, use unrolled VPU FMAs
    kern = functools.partial(_fused_kernel, m_valid=M, padded=(M_pad != M),
                             use_mxu=use_mxu)

    # VMEM budget: double-buffered x & out tiles + small scratch, with headroom.
    tile_bytes = C * tm * itemsize
    vmem_limit = int(min(64 * 1024 * 1024,
                         max(8 * 1024 * 1024, 6 * tile_bytes + 2 * 1024 * 1024)))

    cost = pl.CostEstimate(
        flops=int(4 * C * C * M + 16 * C * M),
        transcendentals=int(2 * C),
        bytes_accessed=int(6 * C * M_pad * itemsize + 2 * C * C * itemsize + 16 * C),
    )

    small_spec = lambda shape: pl.BlockSpec(shape, lambda p, t: (0, 0))
    # TODO(synk): sweep pipeline_mode=pl.Buffered(3) on the x spec for v5e HBM.
    out2 = pl.pallas_call(
        kern,
        out_shape=jax.ShapeDtypeStruct((C, M_pad), io_dtype),
        grid_spec=pltpu.PrefetchScalarGridSpec(
            num_scalar_prefetch=0,
            grid=(3, n_tiles),                    # (phase, M tile) — phase outer
            in_specs=[
                pl.BlockSpec((C, tm), lambda p, t: (0, t)),   # x slab tile
                small_spec((C, C)),                           # w1
                small_spec((C, 1)),                           # gamma1
                small_spec((C, 1)),                           # beta1
                small_spec((C, C)),                           # w2
                small_spec((C, 1)),                           # gamma2
                small_spec((C, 1)),                           # beta2
            ],
            out_specs=pl.BlockSpec((C, tm), lambda p, t: (0, t)),
            scratch_shapes=[
                pltpu.VMEM((C, 128), jnp.float32),   # BN1 partial sum
                pltpu.VMEM((C, 128), jnp.float32),   # BN1 partial sum-of-squares
                pltpu.VMEM((C, 128), jnp.float32),   # BN2 partial sum
                pltpu.VMEM((C, 128), jnp.float32),   # BN2 partial sum-of-squares
                pltpu.VMEM((2, C, 1), jnp.float32),  # BN1 [mean, rstd]
                pltpu.VMEM((2, C, 1), jnp.float32),  # BN2 [mean, rstd]
            ],
        ),
        compiler_params=pltpu.CompilerParams(
            dimension_semantics=("arbitrary", "arbitrary"),
            vmem_limit_bytes=vmem_limit,
        ),
        cost_estimate=cost,
    )(x2, w1, g1, b1, w2, g2, b2)

    out2 = out2[:, :M]                                     # drop lane padding
    return jnp.transpose(out2.reshape(C, N, H, W), (1, 0, 2, 3))


def init_params(key, in_c):
    """Deterministic init matching PyTorch defaults (Conv2d uniform bounds;
    BatchNorm affine params randomized slightly to exercise the path)."""
    params = []
    for _ in range(2):
        key, kw, kb, kg, kbe = jax.random.split(key, 5)
        bound = 1.0 / jnp.sqrt(in_c)
        params.append(
            dict(
                w=jax.random.uniform(kw, (in_c, in_c), jnp.float32, -bound, bound),
                b=jax.random.uniform(kb, (in_c,), jnp.float32, -bound, bound),
                gamma=1.0 + 0.1 * jax.random.normal(kg, (in_c,), jnp.float32),
                beta=0.1 * jax.random.normal(kbe, (in_c,), jnp.float32),
            )
        )
    return params


def _reference_forward(x_nchw, params):
    """Pure-JAX reference of the PyTorch module (training-mode BN), incl. bias."""
    y = x_nchw.astype(jnp.float32)
    for p in params:
        y = jnp.einsum("oc,nchw->nohw", p["w"], y) + p["b"][None, :, None, None]
        mean = jnp.mean(y, axis=(0, 2, 3), keepdims=True)
        var = jnp.mean(jnp.square(y - mean), axis=(0, 2, 3), keepdims=True)
        y = (y - mean) / jnp.sqrt(var + BN_EPS)
        y = y * p["gamma"][None, :, None, None] + p["beta"][None, :, None, None]
        y = jnp.where(y >= 0, y, LEAKY_SLOPE * y)
    return y


if __name__ == "__main__":
    key = jax.random.PRNGKey(0)
    key, kx, kx2 = jax.random.split(key, 3)

    in_c = 4
    N, H, W = 2, 16, 16
    x = jax.random.normal(kx, (N, in_c, H, W), jnp.float32)   # NCHW like PyTorch
    params = init_params(key, in_c)
    ref = _reference_forward(x, params)

    # Single M-tile (M = 512 fits one 512-wide lane tile).
    out = transfer_conv_h_forward(x, params, tile_m=512, io_dtype=jnp.float32)
    out = jax.block_until_ready(out)
    assert out.shape == (N, in_c, H, W), out.shape
    assert jnp.allclose(out, ref, atol=1e-4, rtol=1e-4), float(
        jnp.max(jnp.abs(out - ref)))

    # Multi-tile grid: exercises the accumulate-then-apply BN pipeline.
    out_t = transfer_conv_h_forward(x, params, tile_m=128, io_dtype=jnp.float32)
    out_t = jax.block_until_ready(out_t)
    assert jnp.allclose(out_t, ref, atol=1e-4, rtol=1e-4), float(
        jnp.max(jnp.abs(out_t - ref)))

    # Non-128-aligned spatial size: exercises lane padding + BN stat masking.
    xp = jax.random.normal(kx2, (N, in_c, 5, 5), jnp.float32)
    refp = _reference_forward(xp, params)
    outp = transfer_conv_h_forward(xp, params, tile_m=512, io_dtype=jnp.float32)
    outp = jax.block_until_ready(outp)
    assert jnp.allclose(outp, refp, atol=1e-4, rtol=1e-4), float(
        jnp.max(jnp.abs(outp - refp)))

    print("KERNEL_OK")
</pallas_src>

<mosaic_0001>
module attributes {stable_mosaic.version = 11 : i64} {
  func.func @_fused_kernel(%arg0: i32, %arg1: i32, %arg2: memref<4x512xf32, #tpu.memory_space<vmem>>, %arg3: memref<4x4xf32, #tpu.memory_space<vmem>>, %arg4: memref<4x1xf32, #tpu.memory_space<vmem>>, %arg5: memref<4x1xf32, #tpu.memory_space<vmem>>, %arg6: memref<4x4xf32, #tpu.memory_space<vmem>>, %arg7: memref<4x1xf32, #tpu.memory_space<vmem>>, %arg8: memref<4x1xf32, #tpu.memory_space<vmem>>, %arg9: memref<4x512xf32, #tpu.memory_space<vmem>>, %arg10: memref<4x128xf32, #tpu.memory_space<vmem>>, %arg11: memref<4x128xf32, #tpu.memory_space<vmem>>, %arg12: memref<4x128xf32, #tpu.memory_space<vmem>>, %arg13: memref<4x128xf32, #tpu.memory_space<vmem>>, %arg14: memref<2x4x1xf32, #tpu.memory_space<vmem>>, %arg15: memref<2x4x1xf32, #tpu.memory_space<vmem>>) attributes {dimension_semantics = [#tpu.dimension_semantics<arbitrary>, #tpu.dimension_semantics<arbitrary>], iteration_bounds = array<i64: 3, 1>, scalar_prefetch = 0 : i64, scratch_operands = 6 : i64, tpu.core_type = #tpu.core_type<tc>, window_params = [{transform_indices = @transform_0, window_bounds = array<i64: 4, 512>}, {pipeline_mode = #tpu.pipeline_mode<synchronous>, transform_indices = @transform_1, window_bounds = array<i64: 4, 4>}, {pipeline_mode = #tpu.pipeline_mode<synchronous>, transform_indices = @transform_2, window_bounds = array<i64: 4, 1>}, {pipeline_mode = #tpu.pipeline_mode<synchronous>, transform_indices = @transform_3, window_bounds = array<i64: 4, 1>}, {pipeline_mode = #tpu.pipeline_mode<synchronous>, transform_indices = @transform_4, window_bounds = array<i64: 4, 4>}, {pipeline_mode = #tpu.pipeline_mode<synchronous>, transform_indices = @transform_5, window_bounds = array<i64: 4, 1>}, {pipeline_mode = #tpu.pipeline_mode<synchronous>, transform_indices = @transform_6, window_bounds = array<i64: 4, 1>}, {transform_indices = @transform_7, window_bounds = array<i64: 4, 512>}]} {
    %c0 = arith.constant 0 : index
    %c0_0 = arith.constant 0 : index
    %0 = vector.load %arg2[%c0, %c0_0] : memref<4x512xf32, #tpu.memory_space<vmem>>, vector<4x512xf32>
    %c0_1 = arith.constant 0 : index
    %c0_2 = arith.constant 0 : index
    %1 = vector.load %arg3[%c0_1, %c0_2] : memref<4x4xf32, #tpu.memory_space<vmem>>, vector<4x4xf32>
    %2 = vector.extract_strided_slice %1 {offsets = [0, 0], sizes = [4, 1], strides = [1, 1]} : vector<4x4xf32> to vector<4x1xf32>
    %3 = vector.extract_strided_slice %0 {offsets = [0, 0], sizes = [1, 512], strides = [1, 1]} : vector<4x512xf32> to vector<1x512xf32>
    %4 = vector.broadcast %2 : vector<4x1xf32> to vector<4x512xf32>
    %5 = vector.broadcast %3 : vector<1x512xf32> to vector<4x512xf32>
    %6 = arith.mulf %4, %5 : vector<4x512xf32>
    %7 = vector.extract_strided_slice %1 {offsets = [0, 1], sizes = [4, 1], strides = [1, 1]} : vector<4x4xf32> to vector<4x1xf32>
    %8 = vector.extract_strided_slice %0 {offsets = [1, 0], sizes = [1, 512], strides = [1, 1]} : vector<4x512xf32> to vector<1x512xf32>
    %9 = vector.broadcast %7 : vector<4x1xf32> to vector<4x512xf32>
    %10 = vector.broadcast %8 : vector<1x512xf32> to vector<4x512xf32>
    %11 = arith.mulf %9, %10 : vector<4x512xf32>
    %12 = arith.addf %6, %11 : vector<4x512xf32>
    %13 = vector.extract_strided_slice %1 {offsets = [0, 2], sizes = [4, 1], strides = [1, 1]} : vector<4x4xf32> to vector<4x1xf32>
    %14 = vector.extract_strided_slice %0 {offsets = [2, 0], sizes = [1, 512], strides = [1, 1]} : vector<4x512xf32> to vector<1x512xf32>
    %15 = vector.broadcast %13 : vector<4x1xf32> to vector<4x512xf32>
    %16 = vector.broadcast %14 : vector<1x512xf32> to vector<4x512xf32>
    %17 = arith.mulf %15, %16 : vector<4x512xf32>
    %18 = arith.addf %12, %17 : vector<4x512xf32>
    %19 = vector.extract_strided_slice %1 {offsets = [0, 3], sizes = [4, 1], strides = [1, 1]} : vector<4x4xf32> to vector<4x1xf32>
    %20 = vector.extract_strided_slice %0 {offsets = [3, 0], sizes = [1, 512], strides = [1, 1]} : vector<4x512xf32> to vector<1x512xf32>
    %21 = vector.broadcast %19 : vector<4x1xf32> to vector<4x512xf32>
    %22 = vector.broadcast %20 : vector<1x512xf32> to vector<4x512xf32>
    %23 = arith.mulf %21, %22 : vector<4x512xf32>
    %24 = arith.addf %18, %23 : vector<4x512xf32>
    %c0_i32 = arith.constant 0 : i32
    %25 = arith.cmpi eq, %arg0, %c0_i32 : i32
    %c0_i32_3 = arith.constant 0 : i32
    %26 = arith.cmpi eq, %arg1, %c0_i32_3 : i32
    %27 = arith.andi %25, %26 : i1
    %28 = arith.extui %27 : i1 to i32
    %c0_i32_4 = arith.constant 0 : i32
    %29 = arith.cmpi ne, %28, %c0_i32_4 : i32
    scf.if %29 {
      %cst = arith.constant 0.000000e+00 : f32
      %49 = vector.broadcast %cst : f32 to vector<4x128xf32>
      %c0_15 = arith.constant 0 : index
      %c0_16 = arith.constant 0 : index
      %50 = vector.load %arg10[%c0_15, %c0_16] : memref<4x128xf32, #tpu.memory_space<vmem>>, vector<4x128xf32>
      tpu.vector_store %arg10[%c0_15, %c0_16], %49 {strides = array<i32>} : memref<4x128xf32, #tpu.memory_space<vmem>>, vector<4x128xf32>,
      %cst_17 = arith.constant 0.000000e+00 : f32
      %51 = vector.broadcast %cst_17 : f32 to vector<4x128xf32>
      %c0_18 = arith.constant 0 : index
      %c0_19 = arith.constant 0 : index
      %52 = vector.load %arg11[%c0_18, %c0_19] : memref<4x128xf32, #tpu.memory_space<vmem>>, vector<4x128xf32>
      tpu.vector_store %arg11[%c0_18, %c0_19], %51 {strides = array<i32>} : memref<4x128xf32, #tpu.memory_space<vmem>>, vector<4x128xf32>,
    } else {
    }
    %c0_i32_5 = arith.constant 0 : i32
    %30 = arith.cmpi eq, %arg0, %c0_i32_5 : i32
    %31 = arith.extui %30 : i1 to i32
    %c0_i32_6 = arith.constant 0 : i32
    %32 = arith.cmpi ne, %31, %c0_i32_6 : i32
    scf.if %32 {
      %c0_15 = arith.constant 0 : index
      %c0_16 = arith.constant 0 : index
      %49 = vector.load %arg10[%c0_15, %c0_16] : memref<4x128xf32, #tpu.memory_space<vmem>>, vector<4x128xf32>
      %c0_17 = arith.constant 0 : index
      %c0_18 = arith.constant 0 : index
      %50 = vector.load %arg11[%c0_17, %c0_18] : memref<4x128xf32, #tpu.memory_space<vmem>>, vector<4x128xf32>
      %51 = vector.extract_strided_slice %24 {offsets = [0, 0], sizes = [4, 128], strides = [1, 1]} : vector<4x512xf32> to vector<4x128xf32>
      %52 = arith.addf %49, %51 : vector<4x128xf32>
      %53 = arith.mulf %51, %51 : vector<4x128xf32>
      %54 = arith.addf %50, %53 : vector<4x128xf32>
      %55 = vector.extract_strided_slice %24 {offsets = [0, 128], sizes = [4, 128], strides = [1, 1]} : vector<4x512xf32> to vector<4x128xf32>
      %56 = arith.addf %52, %55 : vector<4x128xf32>
      %57 = arith.mulf %55, %55 : vector<4x128xf32>
      %58 = arith.addf %54, %57 : vector<4x128xf32>
      %59 = vector.extract_strided_slice %24 {offsets = [0, 256], sizes = [4, 128], strides = [1, 1]} : vector<4x512xf32> to vector<4x128xf32>
      %60 = arith.addf %56, %59 : vector<4x128xf32>
      %61 = arith.mulf %59, %59 : vector<4x128xf32>
      %62 = arith.addf %58, %61 : vector<4x128xf32>
      %63 = vector.extract_strided_slice %24 {offsets = [0, 384], sizes = [4, 128], strides = [1, 1]} : vector<4x512xf32> to vector<4x128xf32>
      %64 = arith.addf %60, %63 : vector<4x128xf32>
      %65 = arith.mulf %63, %63 : vector<4x128xf32>
      %66 = arith.addf %62, %65 : vector<4x128xf32>
      %c0_19 = arith.constant 0 : index
      %c0_20 = arith.constant 0 : index
      %67 = vector.load %arg10[%c0_19, %c0_20] : memref<4x128xf32, #tpu.memory_space<vmem>>, vector<4x128xf32>
      tpu.vector_store %arg10[%c0_19, %c0_20], %64 {strides = array<i32>} : memref<4x128xf32, #tpu.memory_space<vmem>>, vector<4x128xf32>,
      %c0_21 = arith.constant 0 : index
      %c0_22 = arith.constant 0 : index
      %68 = vector.load %arg11[%c0_21, %c0_22] : memref<4x128xf32, #tpu.memory_space<vmem>>, vector<4x128xf32>
      tpu.vector_store %arg11[%c0_21, %c0_22], %66 {strides = array<i32>} : memref<4x128xf32, #tpu.memory_space<vmem>>, vector<4x128xf32>,
    } else {
    }
    %c1_i32 = arith.constant 1 : i32
    %33 = arith.cmpi eq, %arg0, %c1_i32 : i32
    %c0_i32_7 = arith.constant 0 : i32
    %34 = arith.cmpi eq, %arg1, %c0_i32_7 : i32
    %35 = arith.andi %33, %34 : i1
    %36 = arith.extui %35 : i1 to i32
    %c0_i32_8 = arith.constant 0 : i32
    %37 = arith.cmpi ne, %36, %c0_i32_8 : i32
    scf.if %37 {
      %c0_15 = arith.constant 0 : index
      %c0_16 = arith.constant 0 : index
      %49 = vector.load %arg10[%c0_15, %c0_16] : memref<4x128xf32, #tpu.memory_space<vmem>>, vector<4x128xf32>
      %cst = arith.constant dense<0.000000e+00> : vector<4xf32>
      %50 = vector.multi_reduction <add>, %49, %cst [1] : vector<4x128xf32> to vector<4xf32>
      %51 = vector.shape_cast %50 : vector<4xf32> to vector<4x1xf32>
      %c0_17 = arith.constant 0 : index
      %c0_18 = arith.constant 0 : index
      %52 = vector.load %arg11[%c0_17, %c0_18] : memref<4x128xf32, #tpu.memory_space<vmem>>, vector<4x128xf32>
      %cst_19 = arith.constant dense<0.000000e+00> : vector<4xf32>
      %53 = vector.multi_reduction <add>, %52, %cst_19 [1] : vector<4x128xf32> to vector<4xf32>
      %54 = vector.shape_cast %53 : vector<4xf32> to vector<4x1xf32>
      %cst_20 = arith.constant 0.001953125 : f32
      %55 = vector.broadcast %cst_20 : f32 to vector<4x1xf32>
      %56 = arith.mulf %51, %55 : vector<4x1xf32>
      %cst_21 = arith.constant 0.001953125 : f32
      %57 = vector.broadcast %cst_21 : f32 to vector<4x1xf32>
      %58 = arith.mulf %54, %57 : vector<4x1xf32>
      %59 = arith.mulf %56, %56 : vector<4x1xf32>
      %60 = arith.subf %58, %59 : vector<4x1xf32>
      %cst_22 = arith.constant 0.000000e+00 : f32
      %61 = vector.broadcast %cst_22 : f32 to vector<4x1xf32>
      %62 = arith.maximumf %60, %61 : vector<4x1xf32>
      %c0_23 = arith.constant 0 : index
      %c0_24 = arith.constant 0 : index
      %c0_25 = arith.constant 0 : index
      %63 = vector.load %arg14[%c0_23, %c0_24, %c0_25] : memref<2x4x1xf32, #tpu.memory_space<vmem>>, vector<1x4x1xf32>
      %64 = vector.shape_cast %63 : vector<1x4x1xf32> to vector<4x1xf32>
      %65 = vector.shape_cast %56 : vector<4x1xf32> to vector<1x4x1xf32>
      tpu.vector_store %arg14[%c0_23, %c0_24, %c0_25], %65 {strides = array<i32>} : memref<2x4x1xf32, #tpu.memory_space<vmem>>, vector<1x4x1xf32>,
      %cst_26 = arith.constant 9.99999974E-6 : f32
      %66 = vector.broadcast %cst_26 : f32 to vector<4x1xf32>
      %67 = arith.addf %62, %66 : vector<4x1xf32>
      %68 = math.rsqrt %67 : vector<4x1xf32>
      %c1 = arith.constant 1 : index
      %c0_27 = arith.constant 0 : index
      %c0_28 = arith.constant 0 : index
      %69 = vector.load %arg14[%c1, %c0_27, %c0_28] : memref<2x4x1xf32, #tpu.memory_space<vmem>>, vector<1x4x1xf32>
      %70 = vector.shape_cast %69 : vector<1x4x1xf32> to vector<4x1xf32>
      %71 = vector.shape_cast %68 : vector<4x1xf32> to vector<1x4x1xf32>
      tpu.vector_store %arg14[%c1, %c0_27, %c0_28], %71 {strides = array<i32>} : memref<2x4x1xf32, #tpu.memory_space<vmem>>, vector<1x4x1xf32>,
      %cst_29 = arith.constant 0.000000e+00 : f32
      %72 = vector.broadcast %cst_29 : f32 to vector<4x128xf32>
      %c0_30 = arith.constant 0 : index
      %c0_31 = arith.constant 0 : index
      %73 = vector.load %arg12[%c0_30, %c0_31] : memref<4x128xf32, #tpu.memory_space<vmem>>, vector<4x128xf32>
      tpu.vector_store %arg12[%c0_30, %c0_31], %72 {strides = array<i32>} : memref<4x128xf32, #tpu.memory_space<vmem>>, vector<4x128xf32>,
      %cst_32 = arith.constant 0.000000e+00 : f32
      %74 = vector.broadcast %cst_32 : f32 to vector<4x128xf32>
      %c0_33 = arith.constant 0 : index
      %c0_34 = arith.constant 0 : index
      %75 = vector.load %arg13[%c0_33, %c0_34] : memref<4x128xf32, #tpu.memory_space<vmem>>, vector<4x128xf32>
      tpu.vector_store %arg13[%c0_33, %c0_34], %74 {strides = array<i32>} : memref<4x128xf32, #tpu.memory_space<vmem>>, vector<4x128xf32>,
    } else {
    }
    %c1_i32_9 = arith.constant 1 : i32
    %38 = arith.cmpi eq, %arg0, %c1_i32_9 : i32
    %39 = arith.extui %38 : i1 to i32
    %c0_i32_10 = arith.constant 0 : i32
    %40 = arith.cmpi ne, %39, %c0_i32_10 : i32
    scf.if %40 {
      %c0_15 = arith.constant 0 : index
      %c0_16 = arith.constant 0 : index
      %c0_17 = arith.constant 0 : index
      %49 = vector.load %arg14[%c0_15, %c0_16, %c0_17] : memref<2x4x1xf32, #tpu.memory_space<vmem>>, vector<1x4x1xf32>
      %50 = vector.shape_cast %49 : vector<1x4x1xf32> to vector<4x1xf32>
      %51 = vector.broadcast %50 : vector<4x1xf32> to vector<4x512xf32>
      %52 = arith.subf %24, %51 : vector<4x512xf32>
      %c1 = arith.constant 1 : index
      %c0_18 = arith.constant 0 : index
      %c0_19 = arith.constant 0 : index
      %53 = vector.load %arg14[%c1, %c0_18, %c0_19] : memref<2x4x1xf32, #tpu.memory_space<vmem>>, vector<1x4x1xf32>
      %54 = vector.shape_cast %53 : vector<1x4x1xf32> to vector<4x1xf32>
      %c0_20 = arith.constant 0 : index
      %c0_21 = arith.constant 0 : index
      %55 = vector.load %arg4[%c0_20, %c0_21] : memref<4x1xf32, #tpu.memory_space<vmem>>, vector<4x1xf32>
      %56 = arith.mulf %54, %55 : vector<4x1xf32>
      %57 = vector.broadcast %56 : vector<4x1xf32> to vector<4x512xf32>
      %58 = arith.mulf %52, %57 : vector<4x512xf32>
      %c0_22 = arith.constant 0 : index
      %c0_23 = arith.constant 0 : index
      %59 = vector.load %arg5[%c0_22, %c0_23] : memref<4x1xf32, #tpu.memory_space<vmem>>, vector<4x1xf32>
      %60 = vector.broadcast %59 : vector<4x1xf32> to vector<4x512xf32>
      %61 = arith.addf %58, %60 : vector<4x512xf32>
      %cst = arith.constant 2.000000e-01 : f32
      %62 = vector.broadcast %cst : f32 to vector<4x512xf32>
      %63 = arith.mulf %62, %61 : vector<4x512xf32>
      %64 = arith.maximumf %61, %63 : vector<4x512xf32>
      %c0_24 = arith.constant 0 : index
      %c0_25 = arith.constant 0 : index
      %65 = vector.load %arg6[%c0_24, %c0_25] : memref<4x4xf32, #tpu.memory_space<vmem>>, vector<4x4xf32>
      %66 = vector.extract_strided_slice %65 {offsets = [0, 0], sizes = [4, 1], strides = [1, 1]} : vector<4x4xf32> to vector<4x1xf32>
      %67 = vector.extract_strided_slice %64 {offsets = [0, 0], sizes = [1, 512], strides = [1, 1]} : vector<4x512xf32> to vector<1x512xf32>
      %68 = vector.broadcast %66 : vector<4x1xf32> to vector<4x512xf32>
      %69 = vector.broadcast %67 : vector<1x512xf32> to vector<4x512xf32>
      %70 = arith.mulf %68, %69 : vector<4x512xf32>
      %71 = vector.extract_strided_slice %65 {offsets = [0, 1], sizes = [4, 1], strides = [1, 1]} : vector<4x4xf32> to vector<4x1xf32>
      %72 = vector.extract_strided_slice %64 {offsets = [1, 0], sizes = [1, 512], strides = [1, 1]} : vector<4x512xf32> to vector<1x512xf32>
      %73 = vector.broadcast %71 : vector<4x1xf32> to vector<4x512xf32>
      %74 = vector.broadcast %72 : vector<1x512xf32> to vector<4x512xf32>
      %75 = arith.mulf %73, %74 : vector<4x512xf32>
      %76 = arith.addf %70, %75 : vector<4x512xf32>
      %77 = vector.extract_strided_slice %65 {offsets = [0, 2], sizes = [4, 1], strides = [1, 1]} : vector<4x4xf32> to vector<4x1xf32>
      %78 = vector.extract_strided_slice %64 {offsets = [2, 0], sizes = [1, 512], strides = [1, 1]} : vector<4x512xf32> to vector<1x512xf32>
      %79 = vector.broadcast %77 : vector<4x1xf32> to vector<4x512xf32>
      %80 = vector.broadcast %78 : vector<1x512xf32> to vector<4x512xf32>
      %81 = arith.mulf %79, %80 : vector<4x512xf32>
      %82 = arith.addf %76, %81 : vector<4x512xf32>
      %83 = vector.extract_strided_slice %65 {offsets = [0, 3], sizes = [4, 1], strides = [1, 1]} : vector<4x4xf32> to vector<4x1xf32>
      %84 = vector.extract_strided_slice %64 {offsets = [3, 0], sizes = [1, 512], strides = [1, 1]} : vector<4x512xf32> to vector<1x512xf32>
      %85 = vector.broadcast %83 : vector<4x1xf32> to vector<4x512xf32>
      %86 = vector.broadcast %84 : vector<1x512xf32> to vector<4x512xf32>
      %87 = arith.mulf %85, %86 : vector<4x512xf32>
      %88 = arith.addf %82, %87 : vector<4x512xf32>
      %c0_26 = arith.constant 0 : index
      %c0_27 = arith.constant 0 : index
      %89 = vector.load %arg12[%c0_26, %c0_27] : memref<4x128xf32, #tpu.memory_space<vmem>>, vector<4x128xf32>
      %c0_28 = arith.constant 0 : index
      %c0_29 = arith.constant 0 : index
      %90 = vector.load %arg13[%c0_28, %c0_29] : memref<4x128xf32, #tpu.memory_space<vmem>>, vector<4x128xf32>
      %91 = vector.extract_strided_slice %88 {offsets = [0, 0], sizes = [4, 128], strides = [1, 1]} : vector<4x512xf32> to vector<4x128xf32>
      %92 = arith.addf %89, %91 : vector<4x128xf32>
      %93 = arith.mulf %91, %91 : vector<4x128xf32>
      %94 = arith.addf %90, %93 : vector<4x128xf32>
      %95 = vector.extract_strided_slice %88 {offsets = [0, 128], sizes = [4, 128], strides = [1, 1]} : vector<4x512xf32> to vector<4x128xf32>
      %96 = arith.addf %92, %95 : vector<4x128xf32>
      %97 = arith.mulf %95, %95 : vector<4x128xf32>
      %98 = arith.addf %94, %97 : vector<4x128xf32>
      %99 = vector.extract_strided_slice %88 {offsets = [0, 256], sizes = [4, 128], strides = [1, 1]} : vector<4x512xf32> to vector<4x128xf32>
      %100 = arith.addf %96, %99 : vector<4x128xf32>
      %101 = arith.mulf %99, %99 : vector<4x128xf32>
      %102 = arith.addf %98, %101 : vector<4x128xf32>
      %103 = vector.extract_strided_slice %88 {offsets = [0, 384], sizes = [4, 128], strides = [1, 1]} : vector<4x512xf32> to vector<4x128xf32>
      %104 = arith.addf %100, %103 : vector<4x128xf32>
      %105 = arith.mulf %103, %103 : vector<4x128xf32>
      %106 = arith.addf %102, %105 : vector<4x128xf32>
      %c0_30 = arith.constant 0 : index
      %c0_31 = arith.constant 0 : index
      %107 = vector.load %arg12[%c0_30, %c0_31] : memref<4x128xf32, #tpu.memory_space<vmem>>, vector<4x128xf32>
      tpu.vector_store %arg12[%c0_30, %c0_31], %104 {strides = array<i32>} : memref<4x128xf32, #tpu.memory_space<vmem>>, vector<4x128xf32>,
      %c0_32 = arith.constant 0 : index
      %c0_33 = arith.constant 0 : index
      %108 = vector.load %arg13[%c0_32, %c0_33] : memref<4x128xf32, #tpu.memory_space<vmem>>, vector<4x128xf32>
      tpu.vector_store %arg13[%c0_32, %c0_33], %106 {strides = array<i32>} : memref<4x128xf32, #tpu.memory_space<vmem>>, vector<4x128xf32>,
    } else {
    }
    %c2_i32 = arith.constant 2 : i32
    %41 = arith.cmpi eq, %arg0, %c2_i32 : i32
    %c0_i32_11 = arith.constant 0 : i32
    %42 = arith.cmpi eq, %arg1, %c0_i32_11 : i32
    %43 = arith.andi %41, %42 : i1
    %44 = arith.extui %43 : i1 to i32
    %c0_i32_12 = arith.constant 0 : i32
    %45 = arith.cmpi ne, %44, %c0_i32_12 : i32
    scf.if %45 {
      %c0_15 = arith.constant 0 : index
      %c0_16 = arith.constant 0 : index
      %49 = vector.load %arg12[%c0_15, %c0_16] : memref<4x128xf32, #tpu.memory_space<vmem>>, vector<4x128xf32>
      %cst = arith.constant dense<0.000000e+00> : vector<4xf32>
      %50 = vector.multi_reduction <add>, %49, %cst [1] : vector<4x128xf32> to vector<4xf32>
      %51 = vector.shape_cast %50 : vector<4xf32> to vector<4x1xf32>
      %c0_17 = arith.constant 0 : index
      %c0_18 = arith.constant 0 : index
      %52 = vector.load %arg13[%c0_17, %c0_18] : memref<4x128xf32, #tpu.memory_space<vmem>>, vector<4x128xf32>
      %cst_19 = arith.constant dense<0.000000e+00> : vector<4xf32>
      %53 = vector.multi_reduction <add>, %52, %cst_19 [1] : vector<4x128xf32> to vector<4xf32>
      %54 = vector.shape_cast %53 : vector<4xf32> to vector<4x1xf32>
      %cst_20 = arith.constant 0.001953125 : f32
      %55 = vector.broadcast %cst_20 : f32 to vector<4x1xf32>
      %56 = arith.mulf %51, %55 : vector<4x1xf32>
      %cst_21 = arith.constant 0.001953125 : f32
      %57 = vector.broadcast %cst_21 : f32 to vector<4x1xf32>
      %58 = arith.mulf %54, %57 : vector<4x1xf32>
      %59 = arith.mulf %56, %56 : vector<4x1xf32>
      %60 = arith.subf %58, %59 : vector<4x1xf32>
      %cst_22 = arith.constant 0.000000e+00 : f32
      %61 = vector.broadcast %cst_22 : f32 to vector<4x1xf32>
      %62 = arith.maximumf %60, %61 : vector<4x1xf32>
      %c0_23 = arith.constant 0 : index
      %c0_24 = arith.constant 0 : index
      %c0_25 = arith.constant 0 : index
      %63 = vector.load %arg15[%c0_23, %c0_24, %c0_25] : memref<2x4x1xf32, #tpu.memory_space<vmem>>, vector<1x4x1xf32>
      %64 = vector.shape_cast %63 : vector<1x4x1xf32> to vector<4x1xf32>
      %65 = vector.shape_cast %56 : vector<4x1xf32> to vector<1x4x1xf32>
      tpu.vector_store %arg15[%c0_23, %c0_24, %c0_25], %65 {strides = array<i32>} : memref<2x4x1xf32, #tpu.memory_space<vmem>>, vector<1x4x1xf32>,
      %cst_26 = arith.constant 9.99999974E-6 : f32
      %66 = vector.broadcast %cst_26 : f32 to vector<4x1xf32>
      %67 = arith.addf %62, %66 : vector<4x1xf32>
      %68 = math.rsqrt %67 : vector<4x1xf32>
      %c1 = arith.constant 1 : index
      %c0_27 = arith.constant 0 : index
      %c0_28 = arith.constant 0 : index
      %69 = vector.load %arg15[%c1, %c0_27, %c0_28] : memref<2x4x1xf32, #tpu.memory_space<vmem>>, vector<1x4x1xf32>
      %70 = vector.shape_cast %69 : vector<1x4x1xf32> to vector<4x1xf32>
      %71 = vector.shape_cast %68 : vector<4x1xf32> to vector<1x4x1xf32>
      tpu.vector_store %arg15[%c1, %c0_27, %c0_28], %71 {strides = array<i32>} : memref<2x4x1xf32, #tpu.memory_space<vmem>>, vector<1x4x1xf32>,
    } else {
    }
    %c2_i32_13 = arith.constant 2 : i32
    %46 = arith.cmpi eq, %arg0, %c2_i32_13 : i32
    %47 = arith.extui %46 : i1 to i32
    %c0_i32_14 = arith.constant 0 : i32
    %48 = arith.cmpi ne, %47, %c0_i32_14 : i32
    scf.if %48 {
      %c0_15 = arith.constant 0 : index
      %c0_16 = arith.constant 0 : index
      %c0_17 = arith.constant 0 : index
      %49 = vector.load %arg14[%c0_15, %c0_16, %c0_17] : memref<2x4x1xf32, #tpu.memory_space<vmem>>, vector<1x4x1xf32>
      %50 = vector.shape_cast %49 : vector<1x4x1xf32> to vector<4x1xf32>
      %51 = vector.broadcast %50 : vector<4x1xf32> to vector<4x512xf32>
      %52 = arith.subf %24, %51 : vector<4x512xf32>
      %c1 = arith.constant 1 : index
      %c0_18 = arith.constant 0 : index
      %c0_19 = arith.constant 0 : index
      %53 = vector.load %arg14[%c1, %c0_18, %c0_19] : memref<2x4x1xf32, #tpu.memory_space<vmem>>, vector<1x4x1xf32>
      %54 = vector.shape_cast %53 : vector<1x4x1xf32> to vector<4x1xf32>
      %c0_20 = arith.constant 0 : index
      %c0_21 = arith.constant 0 : index
      %55 = vector.load %arg4[%c0_20, %c0_21] : memref<4x1xf32, #tpu.memory_space<vmem>>, vector<4x1xf32>
      %56 = arith.mulf %54, %55 : vector<4x1xf32>
      %57 = vector.broadcast %56 : vector<4x1xf32> to vector<4x512xf32>
      %58 = arith.mulf %52, %57 : vector<4x512xf32>
      %c0_22 = arith.constant 0 : index
      %c0_23 = arith.constant 0 : index
      %59 = vector.load %arg5[%c0_22, %c0_23] : memref<4x1xf32, #tpu.memory_space<vmem>>, vector<4x1xf32>
      %60 = vector.broadcast %59 : vector<4x1xf32> to vector<4x512xf32>
      %61 = arith.addf %58, %60 : vector<4x512xf32>
      %cst = arith.constant 2.000000e-01 : f32
      %62 = vector.broadcast %cst : f32 to vector<4x512xf32>
      %63 = arith.mulf %62, %61 : vector<4x512xf32>
      %64 = arith.maximumf %61, %63 : vector<4x512xf32>
      %c0_24 = arith.constant 0 : index
      %c0_25 = arith.constant 0 : index
      %65 = vector.load %arg6[%c0_24, %c0_25] : memref<4x4xf32, #tpu.memory_space<vmem>>, vector<4x4xf32>
      %66 = vector.extract_strided_slice %65 {offsets = [0, 0], sizes = [4, 1], strides = [1, 1]} : vector<4x4xf32> to vector<4x1xf32>
      %67 = vector.extract_strided_slice %64 {offsets = [0, 0], sizes = [1, 512], strides = [1, 1]} : vector<4x512xf32> to vector<1x512xf32>
      %68 = vector.broadcast %66 : vector<4x1xf32> to vector<4x512xf32>
      %69 = vector.broadcast %67 : vector<1x512xf32> to vector<4x512xf32>
      %70 = arith.mulf %68, %69 : vector<4x512xf32>
      %71 = vector.extract_strided_slice %65 {offsets = [0, 1], sizes = [4, 1], strides = [1, 1]} : vector<4x4xf32> to vector<4x1xf32>
      %72 = vector.extract_strided_slice %64 {offsets = [1, 0], sizes = [1, 512], strides = [1, 1]} : vector<4x512xf32> to vector<1x512xf32>
      %73 = vector.broadcast %71 : vector<4x1xf32> to vector<4x512xf32>
      %74 = vector.broadcast %72 : vector<1x512xf32> to vector<4x512xf32>
      %75 = arith.mulf %73, %74 : vector<4x512xf32>
      %76 = arith.addf %70, %75 : vector<4x512xf32>
      %77 = vector.extract_strided_slice %65 {offsets = [0, 2], sizes = [4, 1], strides = [1, 1]} : vector<4x4xf32> to vector<4x1xf32>
      %78 = vector.extract_strided_slice %64 {offsets = [2, 0], sizes = [1, 512], strides = [1, 1]} : vector<4x512xf32> to vector<1x512xf32>
      %79 = vector.broadcast %77 : vector<4x1xf32> to vector<4x512xf32>
      %80 = vector.broadcast %78 : vector<1x512xf32> to vector<4x512xf32>
      %81 = arith.mulf %79, %80 : vector<4x512xf32>
      %82 = arith.addf %76, %81 : vector<4x512xf32>
      %83 = vector.extract_strided_slice %65 {offsets = [0, 3], sizes = [4, 1], strides = [1, 1]} : vector<4x4xf32> to vector<4x1xf32>
      %84 = vector.extract_strided_slice %64 {offsets = [3, 0], sizes = [1, 512], strides = [1, 1]} : vector<4x512xf32> to vector<1x512xf32>
      %85 = vector.broadcast %83 : vector<4x1xf32> to vector<4x512xf32>
      %86 = vector.broadcast %84 : vector<1x512xf32> to vector<4x512xf32>
      %87 = arith.mulf %85, %86 : vector<4x512xf32>
      %88 = arith.addf %82, %87 : vector<4x512xf32>
      %c0_26 = arith.constant 0 : index
      %c0_27 = arith.constant 0 : index
      %c0_28 = arith.constant 0 : index
      %89 = vector.load %arg15[%c0_26, %c0_27, %c0_28] : memref<2x4x1xf32, #tpu.memory_space<vmem>>, vector<1x4x1xf32>
      %90 = vector.shape_cast %89 : vector<1x4x1xf32> to vector<4x1xf32>
      %91 = vector.broadcast %90 : vector<4x1xf32> to vector<4x512xf32>
      %92 = arith.subf %88, %91 : vector<4x512xf32>
      %c1_29 = arith.constant 1 : index
      %c0_30 = arith.constant 0 : index
      %c0_31 = arith.constant 0 : index
      %93 = vector.load %arg15[%c1_29, %c0_30, %c0_31] : memref<2x4x1xf32, #tpu.memory_space<vmem>>, vector<1x4x1xf32>
      %94 = vector.shape_cast %93 : vector<1x4x1xf32> to vector<4x1xf32>
      %c0_32 = arith.constant 0 : index
      %c0_33 = arith.constant 0 : index
      %95 = vector.load %arg7[%c0_32, %c0_33] : memref<4x1xf32, #tpu.memory_space<vmem>>, vector<4x1xf32>
      %96 = arith.mulf %94, %95 : vector<4x1xf32>
      %97 = vector.broadcast %96 : vector<4x1xf32> to vector<4x512xf32>
      %98 = arith.mulf %92, %97 : vector<4x512xf32>
      %c0_34 = arith.constant 0 : index
      %c0_35 = arith.constant 0 : index
      %99 = vector.load %arg8[%c0_34, %c0_35] : memref<4x1xf32, #tpu.memory_space<vmem>>, vector<4x1xf32>
      %100 = vector.broadcast %99 : vector<4x1xf32> to vector<4x512xf32>
      %101 = arith.addf %98, %100 : vector<4x512xf32>
      %cst_36 = arith.constant 2.000000e-01 : f32
      %102 = vector.broadcast %cst_36 : f32 to vector<4x512xf32>
      %103 = arith.mulf %102, %101 : vector<4x512xf32>
      %104 = arith.maximumf %101, %103 : vector<4x512xf32>
      %c0_37 = arith.constant 0 : index
      %c0_38 = arith.constant 0 : index
      %105 = vector.load %arg9[%c0_37, %c0_38] : memref<4x512xf32, #tpu.memory_space<vmem>>, vector<4x512xf32>
      tpu.vector_store %arg9[%c0_37, %c0_38], %104 {strides = array<i32>} : memref<4x512xf32, #tpu.memory_space<vmem>>, vector<4x512xf32>,
    } else {
    }
    return
  }
  func.func @transform_0(%arg0: i32, %arg1: i32) -> (i32, i32) {
    %c0_i32 = arith.constant 0 : i32
    %c0_i32_0 = arith.constant 0 : i32
    return %c0_i32, %arg1 : i32, i32
  }
  func.func @transform_1(%arg0: i32, %arg1: i32) -> (i32, i32) {
    %c0_i32 = arith.constant 0 : i32
    %c0_i32_0 = arith.constant 0 : i32
    %c0_i32_1 = arith.constant 0 : i32
    return %c0_i32, %c0_i32_0 : i32, i32
  }
  func.func @transform_2(%arg0: i32, %arg1: i32) -> (i32, i32) {
    %c0_i32 = arith.constant 0 : i32
    %c0_i32_0 = arith.constant 0 : i32
    %c0_i32_1 = arith.constant 0 : i32
    return %c0_i32, %c0_i32_0 : i32, i32
  }
  func.func @transform_3(%arg0: i32, %arg1: i32) -> (i32, i32) {
    %c0_i32 = arith.constant 0 : i32
    %c0_i32_0 = arith.constant 0 : i32
    %c0_i32_1 = arith.constant 0 : i32
    return %c0_i32, %c0_i32_0 : i32, i32
  }
  func.func @transform_4(%arg0: i32, %arg1: i32) -> (i32, i32) {
    %c0_i32 = arith.constant 0 : i32
    %c0_i32_0 = arith.constant 0 : i32
    %c0_i32_1 = arith.constant 0 : i32
    return %c0_i32, %c0_i32_0 : i32, i32
  }
  func.func @transform_5(%arg0: i32, %arg1: i32) -> (i32, i32) {
    %c0_i32 = arith.constant 0 : i32
    %c0_i32_0 = arith.constant 0 : i32
    %c0_i32_1 = arith.constant 0 : i32
    return %c0_i32, %c0_i32_0 : i32, i32
  }
  func.func @transform_6(%arg0: i32, %arg1: i32) -> (i32, i32) {
    %c0_i32 = arith.constant 0 : i32
    %c0_i32_0 = arith.constant 0 : i32
    %c0_i32_1 = arith.constant 0 : i32
    return %c0_i32, %c0_i32_0 : i32, i32
  }
  func.func @transform_7(%arg0: i32, %arg1: i32) -> (i32, i32) {
    %c0_i32 = arith.constant 0 : i32
    %c0_i32_0 = arith.constant 0 : i32
    return %c0_i32, %arg1 : i32, i32
  }
}

</mosaic_0001>

<bundles_post_ra>
// kernel: transfer_conv_h_forward.1
= control target key start
LH: loop header
LB: loop body
LE: loop exit
PB: predicated region body
PF: predicated region fallthrough
CT: control target
= control target key end

     0   :  { %s1162_s24 = smov 0   ;;  %s1164_s25 = smov 0   ;;  %s1330_s0 = inlined_call_operand.vmem [shape: f32[4,512], index: 0, kind: input, shape index: {}]   ;;  %s1331_s1 = inlined_call_operand.vmem [shape: f32[4,4], index: 1, kind: input, shape index: {}]   ;;  %s1332_s2 = inlined_call_operand.vmem [shape: f32[4,1], index: 2, kind: input, shape index: {}]   ;;  %s1333_s3 = inlined_call_operand.vmem [shape: f32[4,1], index: 3, kind: input, shape index: {}]   ;;  %s1334_s4 = inlined_call_operand.vmem [shape: f32[4,4], index: 4, kind: input, shape index: {}]   ;;  %s1335_s5 = inlined_call_operand.vmem [shape: f32[4,1], index: 5, kind: input, shape index: {}]   ;;  %s1336_s6 = inlined_call_operand.vmem [shape: f32[4,1], index: 6, kind: input, shape index: {}]   ;;  %s1337_s7 = inlined_call_operand.vmem [shape: f32[4,512], index: 7, kind: output, shape index: {}]  }
   0x1   :  { %s1166_s26 = smov 0  }
   0x2 LB: > { %s29_s27 = sadd.s32 1, %s1102_s25  ;;  %p1010_p0 = scmp.ge.s32.totalorder %s1106_s26, 1  ;;  %s1106_s26 = sphi %s1166_s26, %s17_s26   ;;  %s1102_s25 = sphi %s1164_s25, %s1339_s25   ;;  %s1098_s24 = sphi %s1162_s24, %s1338_s24  }
   0x3   : > { %p31_p1 = scmp.ge.s32.totalorder %s29_s27, 3  ;;  %p250_p2 = scmp.lt.s32.totalorder %s1106_s26, 4 }
   0x5   : > { %s1341_s27 = smov (%p31_p1, %s29_s27), 0  ;;  %p251_p3 = pnand %p1010_p0, %p250_p2 }
   0x6   : > { %p488_p4 = scmp.eq.s32.totalorder (!%p251_p3), %s1098_s24, 0 }
   0x7   : > { %254 = sbr.rel (%p251_p3) target bundleno = 851 (0x353), region = 48 }
   0xc   : > { %v296_v0 = vld [vmem:[%s1331_s1] sm:$0xf]  ;;  %v1108_v1 = vmov 0   ;;  %v1109_v2 = vmov 2   ;;  %v1110_v3 = vmov 1   ;;  %v1111_v4 = vmov 3  }
   0xd   : > { %1062 = vset.pattern.permute.xlu0 %v1108_v1  ;;  %1064 = vset.pattern.permute.xlu1 %v1109_v2  ;;  %v304_v5 = vlaneseq  ;;  %v294_v9 = vld [vmem:[%s1330_s0] sm:$0xff]  ;;  %v295_v10 = vld [vmem:[%s1330_s0 + $0x8] sm:$0xff] }
   0xe   : > { %299 = vperm.xlu0 %1062, %v296_v0   ;;  %393 = vperm.xlu1 %1064, %v296_v0  }
   0xf   : > { %v305_v6 = vshrl.u32 %v304_v5, 7 }
  0x11   : > { %v1186_v7 = vsub.s32 0, %v305_v6  ;;  %v310_v8 = vsub.s32 4, %v305_v6  ;;  %v1194_v11 = vsub.s32 2, %v305_v6  ;;  %v402_v12 = vsub.s32 6, %v305_v6 }
  0x12   : > { %1063 = vset.pattern.permute.xlu0 %v1110_v3  ;;  %1065 = vset.pattern.permute.xlu1 %v1111_v4  ;;  %v1196_v13 = vsub.s32 1, %v305_v6  ;;  %v354_v14 = vsub.s32 5, %v305_v6  ;;  %v1198_v15 = vsub.s32 3, %v305_v6  ;;  %v450_v16 = vsub.s32 7, %v305_v6 }
  0x13   : > { %345 = vperm.xlu0 %1063, %v296_v0   ;;  %441 = vperm.xlu1 %1065, %v296_v0   ;;  %v307_v17 = vrot.slane %v294_v9, %v1186_v7  ;;  %v311_v18 = vrot.slane %v294_v9, %v310_v8  ;;  %v315_v19 = vrot.slane %v295_v10, %v1186_v7 }
  0x14   : > { %v319_v20 = vrot.slane %v295_v10, %v310_v8  ;;  %v399_v21 = vrot.slane %v294_v9, %v1194_v11  ;;  %v403_v22 = vrot.slane %v294_v9, %v402_v12  ;;  %v407_v23 = vrot.slane %v295_v10, %v1194_v11 }
  0x15   : > { %v411_v24 = vrot.slane %v295_v10, %v402_v12  ;;  %v351_v25 = vrot.slane %v294_v9, %v1196_v13  ;;  %v355_v26 = vrot.slane %v294_v9, %v354_v14  ;;  %v359_v27 = vrot.slane %v295_v10, %v1196_v13 }
  0x16   : > { %v363_v28 = vrot.slane %v295_v10, %v354_v14  ;;  %v447_v29 = vrot.slane %v294_v9, %v1198_v15  ;;  %v451_v30 = vrot.slane %v294_v9, %v450_v16  ;;  %v455_v31 = vrot.slane %v295_v10, %v1198_v15 }
  0x17   : > { %1066 = vset.pattern.permute.xlu0 %v1111_v4  ;;  %v459_v32 = vrot.slane %v295_v10, %v450_v16  ;;  %v327_v34 = vrot.slane %v307_v17, %v1186_v7  ;;  %v331_v35 = vrot.slane %v311_v18, %v1186_v7  ;;  %v335_v36 = vrot.slane %v315_v19, %v1186_v7 }
  0x18   : > { %v339_v37 = vrot.slane %v319_v20, %v1186_v7  ;;  %v419_v39 = vrot.slane %v399_v21, %v1194_v11  ;;  %v423_v40 = vrot.slane %v403_v22, %v1194_v11  ;;  %v427_v41 = vrot.slane %v407_v23, %v1194_v11 }
  0x19   : > { %v431_v42 = vrot.slane %v411_v24, %v1194_v11  ;;  %v371_v43 = vrot.slane %v351_v25, %v1196_v13  ;;  %v375_v44 = vrot.slane %v355_v26, %v1196_v13  ;;  %v379_v45 = vrot.slane %v359_v27, %v1196_v13 }
  0x1a   : > { %v383_v46 = vrot.slane %v363_v28, %v1196_v13  ;;  %v467_v47 = vrot.slane %v447_v29, %v1198_v15  ;;  %v471_v48 = vrot.slane %v451_v30, %v1198_v15  ;;  %v475_v49 = vrot.slane %v455_v31, %v1198_v15 }
  0x1b   : > { %v479_v50 = vrot.slane %v459_v32, %v1198_v15  ;;  %v1112_v21 = vmov (%p488_p4), 0.0  }
  0x1c   : > { %494 = vst [vmem:[#allocation2] sm:$0xf] (%p488_p4), %v1112_v21  ;;  %495 = vst [vmem:[#allocation3] sm:$0xf] (%p488_p4), %v1112_v21 }
  0x89   : > { %v300_v33 = vpop.permute.xlu0 %299  ;;  %v394_v38 = vpop.permute.xlu1 %393 }
  0x8a   : > { %v340_v51 = vmul.f32 %v327_v34, %v300_v33  ;;  %v341_v52 = vmul.f32 %v331_v35, %v300_v33  ;;  %v342_v53 = vmul.f32 %v335_v36, %v300_v33  ;;  %v343_v54 = vmul.f32 %v339_v37, %v300_v33 }
  0x8b   : > { %v432_v55 = vmul.f32 %v419_v39, %v394_v38  ;;  %v433_v56 = vmul.f32 %v423_v40, %v394_v38  ;;  %v434_v57 = vmul.f32 %v427_v41, %v394_v38  ;;  %v435_v58 = vmul.f32 %v431_v42, %v394_v38 }
  0x8e   : > { %v346_v59 = vpop.permute.xlu0 %345  ;;  %v442_v60 = vpop.permute.xlu1 %441 }
  0x8f   : > { %v384_v61 = vmul.f32 %v371_v43, %v346_v59  ;;  %v385_v62 = vmul.f32 %v375_v44, %v346_v59  ;;  %v386_v63 = vmul.f32 %v379_v45, %v346_v59  ;;  %v387_v0 = vmul.f32 %v383_v46, %v346_v59 }
  0x90   : > { %v480_v1 = vmul.f32 %v467_v47, %v442_v60  ;;  %v481_v2 = vmul.f32 %v471_v48, %v442_v60  ;;  %v482_v3 = vmul.f32 %v475_v49, %v442_v60  ;;  %v483_v4 = vmul.f32 %v479_v50, %v442_v60 }
  0x91   : > { %v388_v5 = vadd.f32 %v384_v61, %v340_v51  ;;  %v389_v6 = vadd.f32 %v385_v62, %v341_v52  ;;  %v390_v8 = vadd.f32 %v386_v63, %v342_v53  ;;  %v391_v9 = vadd.f32 %v387_v0, %v343_v54  ;;  %493 = sbr.rel (!%p488_p4) target bundleno = 150 (0x96), region = 52 }
  0x93   : > { %v436_v10 = vadd.f32 %v432_v55, %v388_v5  ;;  %v437_v12 = vadd.f32 %v433_v56, %v389_v6  ;;  %v438_v14 = vadd.f32 %v434_v57, %v390_v8  ;;  %v439_v16 = vadd.f32 %v435_v58, %v391_v9 }
  0x95   : > { %v1224_v17 = vadd.f32 %v480_v1, %v436_v10  ;;  %v1226_v18 = vadd.f32 %v481_v2, %v437_v12  ;;  %v1228_v19 = vadd.f32 %v482_v3, %v438_v14  ;;  %v1230_v20 = vadd.f32 %v483_v4, %v439_v16 }
  0x96 PF: > { %p1012_p5 = scmp.ne.s32.totalorder %s1098_s24, 0 }
  0x98   : > { %498 = sbr.rel (%p1012_p5) target bundleno = 168 (0xa8), region = 56 }
  0x9d   : > { %v499_v22 = vld [vmem:[#allocation2] sm:$0xf]  ;;  %v500_v23 = vld [vmem:[#allocation3] sm:$0xf]  ;;  %v502_v24 = vmul.f32 %v1224_v17, %v1224_v17  ;;  %v505_v25 = vmul.f32 %v1226_v18, %v1226_v18  ;;  %v508_v28 = vmul.f32 %v1228_v19, %v1228_v19  ;;  %v511_v31 = vmul.f32 %v1230_v20, %v1230_v20 }
  0x9e   : > { %v501_v26 = vadd.f32 %v499_v22, %v1224_v17 }
  0x9f   : > { %v503_v27 = vadd.f32 %v502_v24, %v500_v23 }
  0xa0   : > { %v504_v29 = vadd.f32 %v501_v26, %v1226_v18 }
  0xa1   : > { %v506_v30 = vadd.f32 %v505_v25, %v503_v27 }
  0xa2   : > { %v507_v32 = vadd.f32 %v504_v29, %v1228_v19 }
  0xa3   : > { %v509_v33 = vadd.f32 %v508_v28, %v506_v30 }
  0xa4   : > { %v510_v34 = vadd.f32 %v507_v32, %v1230_v20 }
  0xa5   : > { %v512_v35 = vadd.f32 %v511_v31, %v509_v33 }
  0xa6   : > { %513 = vst [vmem:[#allocation2] sm:$0xf] %v510_v34 }
  0xa7   : > { %514 = vst [vmem:[#allocation3] sm:$0xf] %v512_v35 }
  0xa8 PF: > { %p515_p6 = scmp.eq.s32.totalorder %s1098_s24, 1 }
  0xa9   : > { %vm521_vm0 = vcmask (%p515_p6), 1043456   ;;  %v1113_v40 = vmov (%p515_p6), 0.0   ;;  %vm534_vm1 = vcmask (%p515_p6), 3072  }
  0xaa   : > { %519 = sbr.rel (!%p515_p6) target bundleno = 340 (0x154), region = 60  ;;  %540 = vst [vmem:[#allocation4] sm:$0xf] (%p515_p6), %v1113_v40  ;;  %541 = vst [vmem:[#allocation5] sm:$0xf] (%p515_p6), %v1113_v40 }
  0xad   : > { %v520_v36 = vld [vmem:[#allocation2] sm:$0xf] (%p515_p6) }
  0xae   : > { %v525_v37 = vld [vmem:[#allocation3] sm:$0xf] (%p515_p6)  ;;  %v522_v38 = vsel (%p515_p6), %vm521_vm0, %v520_v36, 0.0 }
  0xaf   : > { %523 = vadd.xlane.f32.xlu0 %v522_v38  ;;  %v526_v39 = vsel %vm521_vm0, %v525_v37, 0.0 }
  0xb3   : > { %527 = vadd.xlane.f32.xlu0 %v526_v39 }
 0x138   : > { %v524_v41 = vpop.xlane.xlu0 %523 }
 0x139   : > { %v529_v42 = vmul.f32 0.001953125, %v524_v41 }
 0x13b   : > { %535 = vst.msk [vmem:[#allocation6] sm:$0xf] %vm534_vm1, %v529_v42  ;;  %v531_v44 = vmul.f32 %v529_v42, %v529_v42 }
 0x13c   : > { %v528_v43 = vpop.xlane.xlu0 %527 }
 0x13d   : > { %v530_v45 = vmul.f32 0.001953125, %v528_v43 }
 0x13f   : > { %v532_v46 = vsub.f32 %v530_v45, %v531_v44 }
 0x141   : > { %v533_v47 = vmax.f32 %v532_v46, 0.0 }
 0x143   : > { %v536_v48 = vadd.f32 1e-05, %v533_v47 }
 0x145   : > { %1067 = vrsqrt.f32 %v536_v48 }
 0x152   : > { %v1068_v49 = vpop.eup %1067 }
 0x153   : > { %539 = vst.msk [vmem:[#allocation6 + $0x4] sm:$0xf] %vm534_vm1, %v1068_v49 }
 0x154 PF: > { %p1014_p7 = scmp.ne.s32.totalorder %s1098_s24, 1 }
 0x156   : > { %544 = sbr.rel (%p1014_p7) target bundleno = 508 (0x1fc), region = 64 }
 0x15b   : > { %v568_v50 = vld [vmem:[%s1333_s3] sm:$0xf]  ;;  %v545_v51 = vld [vmem:[#allocation6] sm:$0xf]  ;;  %v1114_v52 = vmov 0   ;;  %v1115_v57 = vmov 2  }
 0x15c   : > { %1070 = vset.pattern.permute.xlu1 %v1114_v52  ;;  %1069 = vset.pattern.permute.xlu0 %v1114_v52  ;;  %v556_v53 = vld [vmem:[#allocation6 + $0x4] sm:$0xf]  ;;  %v557_v54 = vld [vmem:[%s1332_s2] sm:$0xf]  ;;  %v1116_v58 = vmov 1   ;;  %v1117_v59 = vmov 3  }
 0x15d   : > { %571 = vperm.xlu1 %1070, %v568_v50   ;;  %548 = vperm.xlu0 %1069, %v545_v51   ;;  %v558_v55 = vmul.f32 %v557_v54, %v556_v53  ;;  %v586_v56 = vld [vmem:[%s1334_s4] sm:$0xf] }
 0x161   : > { %589 = vperm.xlu1 %1070, %v586_v56   ;;  %561 = vperm.xlu0 %1069, %v558_v55  }
 0x165   : > { %1072 = vset.pattern.permute.xlu1 %v1115_v57  ;;  %1071 = vset.pattern.permute.xlu0 %v1116_v58 }
 0x166   : > { %641 = vperm.xlu1 %1072, %v586_v56   ;;  %613 = vperm.xlu0 %1071, %v586_v56  }
 0x16a   : > { %1073 = vset.pattern.permute.xlu1 %v1117_v59  ;;  %1074 = vset.pattern.permute.xlu0 %v1117_v59 }
 0x16b   : > { %669 = vperm.xlu1 %1073, %v586_v56  }
 0x1d8   : > { %v549_v60 = vpop.permute.xlu0 %548  ;;  %v572_v1 = vpop.permute.xlu1 %571 }
 0x1d9   : > { %v551_v61 = vsub.f32 %v1224_v17, %v549_v60  ;;  %v552_v62 = vsub.f32 %v1226_v18, %v549_v60  ;;  %v553_v63 = vsub.f32 %v1228_v19, %v549_v60  ;;  %v554_v0 = vsub.f32 %v1230_v20, %v549_v60 }
 0x1dc   : > { %v562_v2 = vpop.permute.xlu0 %561  ;;  %v590_v22 = vpop.permute.xlu1 %589 }
 0x1dd   : > { %v564_v3 = vmul.f32 %v562_v2, %v551_v61  ;;  %v565_v4 = vmul.f32 %v562_v2, %v552_v62  ;;  %v566_v5 = vmul.f32 %v562_v2, %v553_v63  ;;  %v567_v6 = vmul.f32 %v562_v2, %v554_v0 }
 0x1df   : > { %v574_v8 = vadd.f32 %v572_v1, %v564_v3  ;;  %v575_v9 = vadd.f32 %v572_v1, %v565_v4  ;;  %v576_v10 = vadd.f32 %v572_v1, %v566_v5  ;;  %v577_v12 = vadd.f32 %v572_v1, %v567_v6  ;;  %v696_v4 = vld [vmem:[#allocation4] sm:$0xf] }
 0x1e1   : > { %v578_v14 = vmul.f32 0.2, %v574_v8  ;;  %v579_v16 = vmul.f32 0.2, %v575_v9  ;;  %v580_v21 = vmul.f32 0.2, %v576_v10  ;;  %v642_v28 = vpop.permute.xlu1 %641  ;;  %v614_v39 = vpop.permute.xlu0 %613 }
 0x1e2   : > { %v581_v23 = vmul.f32 0.2, %v577_v12 }
 0x1e3   : > { %v582_v24 = vmax.f32 %v574_v8, %v578_v14  ;;  %v583_v25 = vmax.f32 %v575_v9, %v579_v16  ;;  %v584_v26 = vmax.f32 %v576_v10, %v580_v21  ;;  %v697_v10 = vld [vmem:[#allocation5] sm:$0xf] }
 0x1e4   : > { %v585_v27 = vmax.f32 %v577_v12, %v581_v23 }
 0x1e5   : > { %v647_v29 = vrot.slane %v582_v24, %v1194_v11  ;;  %v651_v30 = vrot.slane %v583_v25, %v1194_v11  ;;  %v655_v31 = vrot.slane %v584_v26, %v1194_v11  ;;  %v675_v33 = vrot.slane %v582_v24, %v1198_v15 }
 0x1e6   : > { %v659_v32 = vrot.slane %v585_v27, %v1194_v11  ;;  %v679_v34 = vrot.slane %v583_v25, %v1198_v15  ;;  %v595_v35 = vrot.slane %v582_v24, %v1186_v7  ;;  %v599_v36 = vrot.slane %v583_v25, %v1186_v7  ;;  %v670_v48 = vpop.permute.xlu1 %669 }
 0x1e7   : > { %v603_v37 = vrot.slane %v584_v26, %v1186_v7  ;;  %v607_v38 = vrot.slane %v585_v27, %v1186_v7  ;;  %v619_v40 = vrot.slane %v582_v24, %v1196_v13  ;;  %v623_v41 = vrot.slane %v583_v25, %v1196_v13 }
 0x1e8   : > { %v627_v42 = vrot.slane %v584_v26, %v1196_v13  ;;  %v631_v43 = vrot.slane %v585_v27, %v1196_v13  ;;  %v608_v44 = vmul.f32 %v595_v35, %v590_v22  ;;  %v609_v45 = vmul.f32 %v599_v36, %v590_v22 }
 0x1e9   : > { %v610_v46 = vmul.f32 %v603_v37, %v590_v22  ;;  %v611_v47 = vmul.f32 %v607_v38, %v590_v22  ;;  %v632_v49 = vmul.f32 %v619_v40, %v614_v39  ;;  %v633_v50 = vmul.f32 %v623_v41, %v614_v39 }
 0x1ea   : > { %v634_v51 = vmul.f32 %v627_v42, %v614_v39  ;;  %v635_v52 = vmul.f32 %v631_v43, %v614_v39  ;;  %v660_v53 = vmul.f32 %v647_v29, %v642_v28  ;;  %v661_v54 = vmul.f32 %v651_v30, %v642_v28 }
 0x1eb   : > { %v662_v55 = vmul.f32 %v655_v31, %v642_v28  ;;  %v683_v56 = vrot.slane %v584_v26, %v1198_v15  ;;  %v636_v57 = vadd.f32 %v632_v49, %v608_v44  ;;  %v637_v58 = vadd.f32 %v633_v50, %v609_v45 }
 0x1ec   : > { %v638_v59 = vadd.f32 %v634_v51, %v610_v46  ;;  %v639_v60 = vadd.f32 %v635_v52, %v611_v47  ;;  %v663_v61 = vmul.f32 %v659_v32, %v642_v28  ;;  %v687_v62 = vrot.slane %v585_v27, %v1198_v15 }
 0x1ed   : > { %v688_v63 = vmul.f32 %v675_v33, %v670_v48  ;;  %v689_v0 = vmul.f32 %v679_v34, %v670_v48  ;;  %v664_v1 = vadd.f32 %v660_v53, %v636_v57  ;;  %v665_v2 = vadd.f32 %v661_v54, %v637_v58 }
 0x1ee   : > { %v666_v3 = vadd.f32 %v662_v55, %v638_v59  ;;  %v690_v5 = vmul.f32 %v683_v56, %v670_v48  ;;  %v667_v6 = vadd.f32 %v663_v61, %v639_v60  ;;  %v691_v12 = vmul.f32 %v687_v62, %v670_v48 }
 0x1ef   : > { %v692_v8 = vadd.f32 %v688_v63, %v664_v1  ;;  %v693_v9 = vadd.f32 %v689_v0, %v665_v2 }
 0x1f0   : > { %v694_v14 = vadd.f32 %v690_v5, %v666_v3  ;;  %v695_v22 = vadd.f32 %v691_v12, %v667_v6 }
 0x1f1   : > { %v698_v16 = vadd.f32 %v696_v4, %v692_v8  ;;  %v699_v21 = vmul.f32 %v692_v8, %v692_v8  ;;  %v702_v25 = vmul.f32 %v693_v9, %v693_v9 }
 0x1f2   : > { %v705_v28 = vmul.f32 %v694_v14, %v694_v14  ;;  %v708_v31 = vmul.f32 %v695_v22, %v695_v22 }
 0x1f3   : > { %v700_v23 = vadd.f32 %v699_v21, %v697_v10  ;;  %v701_v24 = vadd.f32 %v698_v16, %v693_v9 }
 0x1f5   : > { %v703_v26 = vadd.f32 %v702_v25, %v700_v23  ;;  %v704_v27 = vadd.f32 %v701_v24, %v694_v14 }
 0x1f7   : > { %v706_v29 = vadd.f32 %v705_v28, %v703_v26  ;;  %v707_v30 = vadd.f32 %v704_v27, %v695_v22 }
 0x1f9   : > { %v709_v32 = vadd.f32 %v708_v31, %v706_v29  ;;  %710 = vst [vmem:[#allocation4] sm:$0xf] %v707_v30 }
 0x1fb   : > { %711 = vst [vmem:[#allocation5] sm:$0xf] %v709_v32 }
 0x1fc PF: > { %p712_p8 = scmp.eq.s32.totalorder %s1098_s24, 2 }
 0x1fd   : > { %vm718_vm2 = vcmask (%p712_p8), 1043456   ;;  %vm731_vm3 = vcmask (%p712_p8), 3072  }
 0x1fe   : > { %716 = sbr.rel (!%p712_p8) target bundleno = 679 (0x2a7), region = 68 }
 0x200   : > { %v717_v33 = vld [vmem:[#allocation4] sm:$0xf] (%p712_p8) }
 0x201   : > { %v719_v35 = vsel (%p712_p8), %vm718_vm2, %v717_v33, 0.0 }
 0x202   : > { %v722_v34 = vld [vmem:[#allocation5] sm:$0xf] (%p712_p8)  ;;  %720 = vadd.xlane.f32.xlu0 (%p712_p8), %v719_v35 }
 0x203   : > { %v723_v36 = vsel %vm718_vm2, %v722_v34, 0.0 }
 0x206   : > { %724 = vadd.xlane.f32.xlu0 %v723_v36 }
 0x28b   : > { %v721_v37 = vpop.xlane.xlu0 %720 }
 0x28c   : > { %v726_v38 = vmul.f32 0.001953125, %v721_v37 }
 0x28e   : > { %732 = vst.msk [vmem:[#allocation7] sm:$0xf] %vm731_vm3, %v726_v38  ;;  %v728_v40 = vmul.f32 %v726_v38, %v726_v38 }
 0x28f   : > { %v725_v39 = vpop.xlane.xlu0 %724 }
 0x290   : > { %v727_v41 = vmul.f32 0.001953125, %v725_v39 }
 0x292   : > { %v729_v42 = vsub.f32 %v727_v41, %v728_v40 }
 0x294   : > { %v730_v43 = vmax.f32 %v729_v42, 0.0 }
 0x296   : > { %v733_v44 = vadd.f32 1e-05, %v730_v43 }
 0x298   : > { %1075 = vrsqrt.f32 %v733_v44 }
 0x2a5   : > { %v1076_v45 = vpop.eup %1075 }
 0x2a6   : > { %736 = vst.msk [vmem:[#allocation7 + $0x4] sm:$0xf] %vm731_vm3, %v1076_v45 }
 0x2a7 PF: > { %p1016_p9 = scmp.ne.s32.totalorder %s1098_s24, 2 }
 0x2a9   : > { %739 = sbr.rel (%p1016_p9) target bundleno = 851 (0x353), region = 72 }
 0x2ae   : > { %v763_v46 = vld [vmem:[%s1333_s3] sm:$0xf]  ;;  %v740_v47 = vld [vmem:[#allocation6] sm:$0xf]  ;;  %v1118_v48 = vmov 0   ;;  %v1119_v53 = vmov 2  }
 0x2af   : > { %1078 = vset.pattern.permute.xlu1 %v1118_v48  ;;  %1077 = vset.pattern.permute.xlu0 %v1118_v48  ;;  %v751_v49 = vld [vmem:[#allocation6 + $0x4] sm:$0xf]  ;;  %v752_v50 = vld [vmem:[%s1332_s2] sm:$0xf]  ;;  %v1120_v54 = vmov 1   ;;  %v1121_v58 = vmov 3  }
 0x2b0   : > { %766 = vperm.xlu1 %1078, %v763_v46   ;;  %743 = vperm.xlu0 %1077, %v740_v47   ;;  %v753_v51 = vmul.f32 %v752_v50, %v751_v49  ;;  %v781_v52 = vld [vmem:[%s1334_s4] sm:$0xf]  ;;  %v891_v55 = vld [vmem:[#allocation7] sm:$0xf]  ;;  %v902_v56 = vld [vmem:[#allocation7 + $0x4] sm:$0xf] }
 0x2b1   : > { %v903_v57 = vld [vmem:[%s1335_s5] sm:$0xf] }
 0x2b2   : > { %v904_v59 = vmul.f32 %v903_v57, %v902_v56  ;;  %v914_v60 = vld [vmem:[%s1336_s6] sm:$0xf] }
 0x2b4   : > { %784 = vperm.xlu1 %1078, %v781_v52   ;;  %756 = vperm.xlu0 %1077, %v753_v51  }
 0x2b8   : > { %1080 = vset.pattern.permute.xlu1 %v1119_v53  ;;  %1079 = vset.pattern.permute.xlu0 %v1120_v54 }
 0x2b9   : > { %836 = vperm.xlu1 %1080, %v781_v52   ;;  %808 = vperm.xlu0 %1079, %v781_v52  }
 0x2bd   : > { %1081 = vset.pattern.permute.xlu1 %v1121_v58  ;;  %1082 = vset.pattern.permute.xlu0 %v1118_v48 }
 0x2be   : > { %864 = vperm.xlu1 %1081, %v781_v52   ;;  %894 = vperm.xlu0 %1082, %v891_v55  }
 0x2c2   : > { %1083 = vset.pattern.permute.xlu1 %v1118_v48 }
 0x2c3   : > { %907 = vperm.xlu1 %1083, %v904_v59  }
 0x2c7   : > { %917 = vperm.xlu1 %1083, %v914_v60  }
 0x32b   : > { %v744_v61 = vpop.permute.xlu0 %743  ;;  %v767_v62 = vpop.permute.xlu1 %766 }
 0x32c   : > { %v746_v63 = vsub.f32 %v1224_v17, %v744_v61  ;;  %v747_v0 = vsub.f32 %v1226_v18, %v744_v61  ;;  %v748_v1 = vsub.f32 %v1228_v19, %v744_v61  ;;  %v749_v2 = vsub.f32 %v1230_v20, %v744_v61 }
 0x32f   : > { %v757_v3 = vpop.permute.xlu0 %756  ;;  %v785_v16 = vpop.permute.xlu1 %784 }
 0x330   : > { %v759_v4 = vmul.f32 %v757_v3, %v746_v63  ;;  %v760_v5 = vmul.f32 %v757_v3, %v747_v0  ;;  %v761_v6 = vmul.f32 %v757_v3, %v748_v1  ;;  %v762_v8 = vmul.f32 %v757_v3, %v749_v2 }
 0x332   : > { %v769_v9 = vadd.f32 %v767_v62, %v759_v4  ;;  %v770_v10 = vadd.f32 %v767_v62, %v760_v5  ;;  %v771_v12 = vadd.f32 %v767_v62, %v761_v6  ;;  %v772_v14 = vadd.f32 %v767_v62, %v762_v8 }
 0x334   : > { %v773_v21 = vmul.f32 0.2, %v769_v9  ;;  %v774_v22 = vmul.f32 0.2, %v770_v10  ;;  %v775_v23 = vmul.f32 0.2, %v771_v12  ;;  %v837_v26 = vpop.permute.xlu1 %836  ;;  %v809_v38 = vpop.permute.xlu0 %808 }
 0x335   : > { %v776_v17 = vmul.f32 0.2, %v772_v14 }
 0x336   : > { %v777_v24 = vmax.f32 %v769_v9, %v773_v21  ;;  %v778_v18 = vmax.f32 %v770_v10, %v774_v22  ;;  %v779_v25 = vmax.f32 %v771_v12, %v775_v23 }
 0x337   : > { %v780_v19 = vmax.f32 %v772_v14, %v776_v17 }
 0x338   : > { %v842_v20 = vrot.slane %v777_v24, %v1194_v11  ;;  %v846_v27 = vrot.slane %v778_v18, %v1194_v11  ;;  %v850_v28 = vrot.slane %v779_v25, %v1194_v11  ;;  %v870_v29 = vrot.slane %v777_v24, %v1198_v15 }
 0x339   : > { %v854_v30 = vrot.slane %v780_v19, %v1194_v11  ;;  %v874_v31 = vrot.slane %v778_v18, %v1198_v15  ;;  %v878_v32 = vrot.slane %v779_v25, %v1198_v15  ;;  %v882_v33 = vrot.slane %v780_v19, %v1198_v15  ;;  %v865_v42 = vpop.permute.xlu1 %864  ;;  %v895_v1 = vpop.permute.xlu0 %894 }
 0x33a   : > { %v790_v34 = vrot.slane %v777_v24, %v1186_v7  ;;  %v794_v35 = vrot.slane %v778_v18, %v1186_v7  ;;  %v798_v36 = vrot.slane %v779_v25, %v1186_v7  ;;  %v802_v37 = vrot.slane %v780_v19, %v1186_v7 }
 0x33b   : > { %v814_v39 = vrot.slane %v777_v24, %v1196_v13  ;;  %v818_v40 = vrot.slane %v778_v18, %v1196_v13  ;;  %v822_v11 = vrot.slane %v779_v25, %v1196_v13  ;;  %v826_v41 = vrot.slane %v780_v19, %v1196_v13 }
 0x33c   : > { %v803_v43 = vmul.f32 %v790_v34, %v785_v16  ;;  %v804_v15 = vmul.f32 %v794_v35, %v785_v16  ;;  %v805_v44 = vmul.f32 %v798_v36, %v785_v16  ;;  %v806_v45 = vmul.f32 %v802_v37, %v785_v16 }
 0x33d   : > { %v827_v46 = vmul.f32 %v814_v39, %v809_v38  ;;  %v828_v47 = vmul.f32 %v818_v40, %v809_v38  ;;  %v829_v48 = vmul.f32 %v822_v11, %v809_v38  ;;  %v830_v49 = vmul.f32 %v826_v41, %v809_v38 }
 0x33e   : > { %v855_v50 = vmul.f32 %v842_v20, %v837_v26  ;;  %v856_v7 = vmul.f32 %v846_v27, %v837_v26  ;;  %v857_v51 = vmul.f32 %v850_v28, %v837_v26  ;;  %v858_v52 = vmul.f32 %v854_v30, %v837_v26  ;;  %v908_v0 = vpop.permute.xlu1 %907 }
 0x33f   : > { %v831_v53 = vadd.f32 %v827_v46, %v803_v43  ;;  %v832_v54 = vadd.f32 %v828_v47, %v804_v15  ;;  %v833_v55 = vadd.f32 %v829_v48, %v805_v44  ;;  %v834_v56 = vadd.f32 %v830_v49, %v806_v45 }
 0x340   : > { %v883_v57 = vmul.f32 %v870_v29, %v865_v42  ;;  %v884_v58 = vmul.f32 %v874_v31, %v865_v42  ;;  %v885_v13 = vmul.f32 %v878_v32, %v865_v42  ;;  %v886_v59 = vmul.f32 %v882_v33, %v865_v42 }
 0x341   : > { %v859_v60 = vadd.f32 %v855_v50, %v831_v53  ;;  %v860_v61 = vadd.f32 %v856_v7, %v832_v54  ;;  %v861_v62 = vadd.f32 %v857_v51, %v833_v55  ;;  %v862_v63 = vadd.f32 %v858_v52, %v834_v56 }
 0x342   : > { %v918_v22 = vpop.permute.xlu1 %917 }
 0x343   : > { %v887_v2 = vadd.f32 %v883_v57, %v859_v60  ;;  %v888_v3 = vadd.f32 %v884_v58, %v860_v61  ;;  %v889_v4 = vadd.f32 %v885_v13, %v861_v62  ;;  %v890_v5 = vadd.f32 %v886_v59, %v862_v63 }
 0x345   : > { %v897_v6 = vsub.f32 %v887_v2, %v895_v1  ;;  %v898_v8 = vsub.f32 %v888_v3, %v895_v1  ;;  %v899_v9 = vsub.f32 %v889_v4, %v895_v1  ;;  %v900_v10 = vsub.f32 %v890_v5, %v895_v1 }
 0x347   : > { %v910_v12 = vmul.f32 %v908_v0, %v897_v6  ;;  %v911_v14 = vmul.f32 %v908_v0, %v898_v8  ;;  %v912_v16 = vmul.f32 %v908_v0, %v899_v9  ;;  %v913_v21 = vmul.f32 %v908_v0, %v900_v10 }
 0x349   : > { %v920_v23 = vadd.f32 %v918_v22, %v910_v12  ;;  %v921_v17 = vadd.f32 %v918_v22, %v911_v14  ;;  %v922_v24 = vadd.f32 %v918_v22, %v912_v16  ;;  %v923_v18 = vadd.f32 %v918_v22, %v913_v21 }
 0x34b   : > { %v924_v25 = vmul.f32 0.2, %v920_v23  ;;  %v925_v19 = vmul.f32 0.2, %v921_v17  ;;  %v926_v26 = vmul.f32 0.2, %v922_v24 }
 0x34c   : > { %v927_v20 = vmul.f32 0.2, %v923_v18 }
 0x34d   : > { %v928_v27 = vmax.f32 %v920_v23, %v924_v25  ;;  %v929_v28 = vmax.f32 %v921_v17, %v925_v19  ;;  %v930_v29 = vmax.f32 %v922_v24, %v926_v26 }
 0x34e   : > { %v931_v30 = vmax.f32 %v923_v18, %v927_v20 }
 0x34f   : > { %v936_v31 = vcombine.low %v928_v27, %v929_v28 }
 0x350   : > { %v937_v32 = vcombine.low %v930_v29, %v931_v30 }
 0x351   : > { %940 = vst [vmem:[%s1337_s7] sm:$0xff] %v936_v31 }
 0x352   : > { %941 = vst [vmem:[%s1337_s7 + $0x8] sm:$0xff] %v937_v32 }
 0x353 PF: > { %s17_s26 = sadd.s32 1, %s1106_s26   ;;  %s1338_s24 = smov %s1102_s25 }
 0x354   : > { %p14_p10 = scmp.ge.s32.totalorder %s17_s26, 5   ;;  %s1339_s25 = smov %s1341_s27 }
 0x356   :  { %16 = sbr.rel (!%p14_p10) target bundleno = 2 (0x2), region = 107 }

</bundles_post_ra>
